<compile_context>
chip_gen: v6e
topology: v6e:2x2x1
jax: 0.10.0
libtpu: 0.0.40
codegen_flags: <defaults>
</compile_context>

<pallas_src>
import functools

import jax
import jax.numpy as jnp
from jax.experimental import pallas as pl
from jax.experimental.pallas import tpu as pltpu


# ------------------------------ Pallas kernel --------------------------------

def _temporal_block_kernel(*refs, k, d, has_down, use_halo, multi_tile):
    """Fused TemporalBlock: conv1 -> chomp -> ReLU -> conv2 -> chomp -> ReLU
    -> (+ residual / folded 1x1 downsample) -> ReLU.  One grid step per
    (batch element, sequence tile).

    refs = [halo?] x  w1c  b1  w2f  b2  [bd]  |  out  |  xs_scratch  hs_scratch
      w1c : (C_out[+C_out], k*C_in)  folded conv1 taps (+ zero-padded 1x1 rows)
      w2f : (C_out, k*C_out)         folded conv2 taps
    """
    refs = list(refs)
    halo_ref = refs.pop(0) if use_halo else None
    x_ref, w1_ref, b1_ref, w2_ref, b2_ref = refs[:5]
    refs = refs[5:]
    if has_down:
        bd_ref, o_ref, xs_ref, hs_ref = refs
    else:
        bd_ref = None
        o_ref, xs_ref, hs_ref = refs

    C_in, T = x_ref.shape[1], x_ref.shape[2]
    C_out = o_ref.shape[1]
    pad1 = (k - 1) * d            # single-conv causal padding (== chomp size)
    Lh = pad1 + T                 # conv1 is produced over seq positions [t0-pad1, t0+T)
    li = pl.program_id(1)

    x_cur = x_ref[0]              # (C_in, T): seq positions [t0, t0+T)

    # Halo = x over [t0-hp, t0); forced to zero on the first tile (causal pad).
    if use_halo:
        hp = halo_ref.shape[2]
        halo = jnp.where(li > 0, halo_ref[0], jnp.zeros_like(halo_ref[0]))
    else:
        hp, halo = 0, None

    # ---- im2col along channels (one deep-K MXU matmul instead of k shallow):
    #      Xs[j*C_in + i, c] = x[i, t0 - pad1 + c - j*d]   (zero if position < 0)
    for j in range(k):
        off = min(pad1 + j * d, Lh)           # columns [0, off) lie left of the tile
        if off > 0:
            if halo is not None:
                left = halo[:, hp - off:hp]
            else:
                left = jnp.zeros((C_in, off), xs_ref.dtype)
            xs_ref[pl.ds(j * C_in, C_in), pl.ds(0, off)] = left.astype(xs_ref.dtype)
        main_w = T - j * d
        if main_w > 0:
            main = x_cur if j == 0 else x_cur[:, :main_w]
            xs_ref[pl.ds(j * C_in, C_in), pl.ds(off, main_w)] = main.astype(xs_ref.dtype)

    # ---- conv1 (+ folded 1x1 downsample rows): single MXU matmul, f32 accum.
    y1 = jnp.dot(w1_ref[...], xs_ref[...], preferred_element_type=jnp.float32)
    if has_down:
        res = y1[C_out:, pad1:pad1 + T] + bd_ref[...]          # (C_out, T)
        h = y1[:C_out]
    else:
        res = x_cur.astype(jnp.float32)
        h = y1
    h = jnp.maximum(h + b1_ref[...], 0.0).astype(hs_ref.dtype)  # (C_out, Lh)

    # ---- im2col for conv2: Hs[j*C_out + o, c] = h[o, pad1 + c - j*d]
    for j in range(k):
        s = pad1 - j * d
        hs_ref[pl.ds(j * C_out, C_out), :] = h[:, s:s + T]

    # conv2's causal padding: h at seq positions < 0 must read as exact zeros.
    # Only the first sequence tile touches those positions, so only zero the
    # few affected scratch columns there (no full-slab mask every step).
    if pad1 > 0 and k > 1:
        def _zero_causal_pad():
            for j in range(1, k):
                w = min(j * d, T)
                if w > 0:
                    hs_ref[pl.ds(j * C_out, C_out), pl.ds(0, w)] = jnp.zeros(
                        (C_out, w), hs_ref.dtype)
        if multi_tile:
            @pl.when(li == 0)
            def _():
                _zero_causal_pad()
        else:
            _zero_causal_pad()

    # ---- conv2 + bias + ReLU: single MXU matmul, f32 accum.
    out = jnp.dot(w2_ref[...], hs_ref[...], preferred_element_type=jnp.float32)
    out = jnp.maximum(out + b2_ref[...], 0.0)                   # (C_out, T)

    # ---- residual add + final ReLU (lane-dense NCL store).
    o_ref[0] = jnp.maximum(out + res, 0.0).astype(o_ref.dtype)


# -------------------------------- wrapper ------------------------------------

def _vmem_capacity_bytes():
    try:
        return int(pltpu.get_tpu_info().vmem_capacity_bytes)   # 64 MiB/TC on v7x
    except Exception:
        return 128 * 1024 * 1024                               # v5e / v6e


def _round_up(x, m):
    return -(-x // m) * m


def _step_vmem_bytes(T, *, C_in, C_out, k, pad1, hp, itemsize, multi_tile, has_down):
    """Rough per-grid-step VMEM working set (double-buffered IO + scratch)."""
    Lh = pad1 + T
    f32 = 4
    rows1 = C_out * (2 if has_down else 1)
    b = 2 * C_in * T * itemsize                      # x tile (double buffered)
    if multi_tile:
        b += 2 * C_in * hp * itemsize                # halo tile
    b += 2 * C_out * T * itemsize                    # output tile
    b += k * C_in * Lh * itemsize                    # Xs scratch
    b += k * C_out * T * itemsize                    # Hs scratch
    b += (rows1 + C_out) * Lh * f32                  # matmul result + h values
    b += 2 * C_out * T * f32                         # conv2 out + residual
    b += 2 * (k * C_in * rows1 + k * C_out * C_out + 4 * C_out) * itemsize
    return b


def _pick_seq_tile(L, halo, hp, *, C_in, C_out, k, itemsize, has_down, budget,
                   seq_tile=None):
    """Return (T, multi_tile).  Prefers T == L (no halo refetch / masking)."""
    pad1 = halo // 2
    est = functools.partial(_step_vmem_bytes, C_in=C_in, C_out=C_out, k=k,
                            pad1=pad1, hp=hp, itemsize=itemsize,
                            has_down=has_down)
    if seq_tile is not None:                         # explicit override (tests)
        ok = (seq_tile < L and L % seq_tile == 0 and seq_tile >= halo
              and (hp == 0 or seq_tile % hp == 0))
        return (seq_tile, True) if ok else (L, False)
    if est(L, multi_tile=False) <= budget:
        return L, False
    for t in (16384, 8192, 4096, 2048, 1024, 512, 256, 128):
        if (t < L and L % t == 0 and t >= halo and (hp == 0 or t % hp == 0)
                and est(t, multi_tile=True) <= budget):
            return t, True
    return L, False                                  # fallback: one big tile


def temporal_block(x, w1, b1, w2, b2, wd, bd, *, k, d, seq_tile=None):
    """Fused TemporalBlock.  x: (B, C_in, L) NCL; w1/w2: (k, C_out, C) stacked
    so tap j multiplies x[t - j*d].  Returns (B, C_out, L)."""
    B, C_in, L = x.shape
    C_out = b1.shape[0]
    pad1 = (k - 1) * d
    halo = 2 * pad1
    hp = _round_up(halo, 128) if halo > 0 else 0
    has_down = wd is not None

    cap = _vmem_capacity_bytes()
    T, multi_tile = _pick_seq_tile(
        L, halo, hp, C_in=C_in, C_out=C_out, k=k, itemsize=x.dtype.itemsize,
        has_down=has_down, budget=int(0.5 * cap), seq_tile=seq_tile)
    num_tiles = L // T
    use_halo = multi_tile and halo > 0
    Lh = pad1 + T

    # Fold the k dilated taps (and the 1x1 downsample) into single deep-K
    # MXU weights: (C_out, k*C_in) and (C_out, k*C_out).
    w1f = w1.transpose(1, 0, 2).reshape(C_out, k * C_in).astype(x.dtype)
    w2f = w2.transpose(1, 0, 2).reshape(C_out, k * C_out).astype(x.dtype)
    if has_down:
        wd_pad = jnp.concatenate(
            [wd.astype(x.dtype), jnp.zeros((C_out, (k - 1) * C_in), x.dtype)],
            axis=1)
        w1c = jnp.concatenate([w1f, wd_pad], axis=0)          # (2*C_out, k*C_in)
    else:
        w1c = w1f

    kernel = functools.partial(_temporal_block_kernel, k=k, d=d,
                               has_down=has_down, use_halo=use_halo,
                               multi_tile=multi_tile)

    def _const(shape):
        return pl.BlockSpec(shape, lambda b, li: (0,) * len(shape))

    in_specs, args = [], []
    if use_halo:
        nb = T // hp          # halo = hp columns of x ending at the tile start
        in_specs.append(pl.BlockSpec(
            (1, C_in, hp), lambda b, li: (b, 0, jnp.maximum(li * nb - 1, 0))))
        args.append(x)
    in_specs += [
        pl.BlockSpec((1, C_in, T), lambda b, li: (b, 0, li)),
        _const(w1c.shape),
        _const((C_out, 1)),
        _const(w2f.shape),
        _const((C_out, 1)),
    ]
    args += [x, w1c, b1.reshape(C_out, 1).astype(jnp.float32),
             w2f, b2.reshape(C_out, 1).astype(jnp.float32)]
    if has_down:
        in_specs.append(_const((C_out, 1)))
        args.append(bd.reshape(C_out, 1).astype(jnp.float32))

    flops = 2 * B * L * (k * C_in * C_out + k * C_out * C_out
                         + (C_in * C_out if has_down else 0))
    bytes_accessed = ((x.size + B * C_out * L) * x.dtype.itemsize
                      + (w1c.size + w2f.size) * x.dtype.itemsize
                      + 12 * C_out
                      + (B * num_tiles * C_in * hp * x.dtype.itemsize
                         if use_halo else 0))

    est = _step_vmem_bytes(T, C_in=C_in, C_out=C_out, k=k, pad1=pad1, hp=hp,
                           itemsize=x.dtype.itemsize, multi_tile=multi_tile,
                           has_down=has_down)
    vmem_limit = int(min(0.8 * cap, max(2 * est, 32 * 1024 * 1024)))

    return pl.pallas_call(
        kernel,
        out_shape=jax.ShapeDtypeStruct((B, C_out, L), x.dtype),
        grid=(B, num_tiles),
        in_specs=in_specs,
        out_specs=pl.BlockSpec((1, C_out, T), lambda b, li: (b, 0, li)),
        scratch_shapes=[pltpu.VMEM((k * C_in, Lh), x.dtype),
                        pltpu.VMEM((k * C_out, T), x.dtype)],
        compiler_params=pltpu.CompilerParams(
            dimension_semantics=("parallel", "parallel"),
            vmem_limit_bytes=vmem_limit),
        cost_estimate=pl.CostEstimate(
            flops=int(flops), transcendentals=0,
            bytes_accessed=int(bytes_accessed)),
    )(*args)


# ------------------------ parameters / model glue -----------------------------

def _weight_norm_effective(v, g):
    # PyTorch weight_norm (dim=0 default for Conv1d): w = g * v / ||v||_{(1,2)}
    norm = jnp.sqrt(jnp.sum(v * v, axis=(1, 2), keepdims=True))
    return g[:, None, None] * v / norm


def _stack_taps(w):
    # (C_out, C_in, k) -> (k, C_out, C_in); entry j multiplies x[t - j*d]
    # (PyTorch cross-correlation => reversed tap order).
    return jnp.flip(w, axis=2).transpose(2, 0, 1)


def make_tcn_params(key, num_inputs, num_channels, kernel_size):
    """Deterministic synthetic parameters mirroring the PyTorch module shapes."""
    params = []
    in_ch = num_inputs
    for i, out_ch in enumerate(num_channels):
        key, k1, k2, k3, k4, k5, k6 = jax.random.split(key, 7)
        v1 = 0.01 * jax.random.normal(k1, (out_ch, in_ch, kernel_size), jnp.float32)
        g1 = jnp.sqrt(jnp.sum(v1 * v1, axis=(1, 2)))     # weight_norm init: g = ||v||
        b1 = 0.1 * jax.random.normal(k2, (out_ch,), jnp.float32)
        v2 = 0.01 * jax.random.normal(k3, (out_ch, out_ch, kernel_size), jnp.float32)
        g2 = jnp.sqrt(jnp.sum(v2 * v2, axis=(1, 2)))
        b2 = 0.1 * jax.random.normal(k4, (out_ch,), jnp.float32)
        if in_ch != out_ch:
            wd = 0.01 * jax.random.normal(k5, (out_ch, in_ch), jnp.float32)  # 1x1 conv
            bd = 0.1 * jax.random.normal(k6, (out_ch,), jnp.float32)
        else:
            wd, bd = None, None
        params.append(dict(v1=v1, g1=g1, b1=b1, v2=v2, g2=g2, b2=b2,
                           wd=wd, bd=bd, dilation=2 ** i))
        in_ch = out_ch
    return params


def temporal_conv_net(x_ncl, params, seq_tile=None):
    """Forward pass.  x_ncl: (B, num_inputs, L) -> (B, num_channels[-1], L)."""
    x = x_ncl
    for p in params:
        k = p["v1"].shape[2]
        w1 = _stack_taps(_weight_norm_effective(p["v1"], p["g1"]))
        w2 = _stack_taps(_weight_norm_effective(p["v2"], p["g2"]))
        # TODO(synk): nn.Dropout is identity at inference; training-mode dropout omitted.
        x = temporal_block(x, w1, p["b1"], w2, p["b2"], p["wd"], p["bd"],
                           k=k, d=p["dilation"], seq_tile=seq_tile)
    return x


# ----------------------- pure-JAX reference (for checking) --------------------

def _causal_conv_ref(x, w_taps, b, d):
    k, L = w_taps.shape[0], x.shape[2]
    acc = None
    for j in range(k):
        xs = x if j * d == 0 else jnp.pad(x, ((0, 0), (0, 0), (j * d, 0)))[:, :, :L]
        t = jnp.einsum('oi,bil->bol', w_taps[j].astype(jnp.float32),
                       xs.astype(jnp.float32))
        acc = t if acc is None else acc + t
    return acc + b.astype(jnp.float32)[None, :, None]


def temporal_block_ref(x, w1, b1, w2, b2, wd, bd, *, d):
    h = jax.nn.relu(_causal_conv_ref(x, w1, b1, d))
    out = jax.nn.relu(_causal_conv_ref(h, w2, b2, d))
    if wd is not None:
        res = (jnp.einsum('oi,bil->bol', wd.astype(jnp.float32),
                          x.astype(jnp.float32))
               + bd.astype(jnp.float32)[None, :, None])
    else:
        res = x.astype(jnp.float32)
    return jax.nn.relu(out + res)


def temporal_conv_net_ref(x_ncl, params):
    x = x_ncl.astype(jnp.float32)
    for p in params:
        w1 = _stack_taps(_weight_norm_effective(p["v1"], p["g1"]))
        w2 = _stack_taps(_weight_norm_effective(p["v2"], p["g2"]))
        x = temporal_block_ref(x, w1, p["b1"], w2, p["b2"], p["wd"], p["bd"],
                               d=p["dilation"])
    return x


# ----------------------------------- main -------------------------------------

if __name__ == "__main__":
    key = jax.random.PRNGKey(0)
    k_param, k_x, k_x2 = jax.random.split(key, 3)

    B = 2            # batch
    num_inputs = 4   # input channels
    L = 16           # sequence length
    num_channels = (8, 8)
    kernel_size = 2

    params = make_tcn_params(k_param, num_inputs, num_channels, kernel_size)

    # --- single-tile path (T == L) ---
    x = jax.random.normal(k_x, (B, num_inputs, L), jnp.float32)  # PyTorch NCL layout
    y = temporal_conv_net(x, params)
    jax.block_until_ready(y)
    assert y.shape == (B, num_channels[-1], L), y.shape
    y_ref = temporal_conv_net_ref(x, params)
    err = float(jnp.max(jnp.abs(y.astype(jnp.float32) - y_ref)))
    assert err < 1e-2, f"single-tile mismatch: max abs err {err}"

    # --- multi-tile path (halo fetch + first-tile causal masking) ---
    L2 = 256
    x2 = jax.random.normal(k_x2, (B, num_inputs, L2), jnp.float32)
    y2 = temporal_conv_net(x2, params, seq_tile=128)
    jax.block_until_ready(y2)
    assert y2.shape == (B, num_channels[-1], L2), y2.shape
    y2_ref = temporal_conv_net_ref(x2, params)
    err2 = float(jnp.max(jnp.abs(y2.astype(jnp.float32) - y2_ref)))
    assert err2 < 1e-2, f"multi-tile mismatch: max abs err {err2}"

    print("KERNEL_OK")
</pallas_src>

<mosaic_0001>
module attributes {stable_mosaic.version = 11 : i64} {
  func.func @_temporal_block_kernel(%arg0: i32, %arg1: i32, %arg2: memref<1x4x16xf32, #tpu.memory_space<vmem>>, %arg3: memref<16x8xf32, #tpu.memory_space<vmem>>, %arg4: memref<8x1xf32, #tpu.memory_space<vmem>>, %arg5: memref<8x16xf32, #tpu.memory_space<vmem>>, %arg6: memref<8x1xf32, #tpu.memory_space<vmem>>, %arg7: memref<8x1xf32, #tpu.memory_space<vmem>>, %arg8: memref<1x8x16xf32, #tpu.memory_space<vmem>>, %arg9: memref<8x17xf32, #tpu.memory_space<vmem>>, %arg10: memref<16x16xf32, #tpu.memory_space<vmem>>) attributes {dimension_semantics = [#tpu.dimension_semantics<parallel>, #tpu.dimension_semantics<parallel>], iteration_bounds = array<i64: 2, 1>, scalar_prefetch = 0 : i64, scratch_operands = 2 : i64, tpu.core_type = #tpu.core_type<tc>, window_params = [{transform_indices = @transform_0, window_bounds = array<i64: 1, 4, 16>}, {pipeline_mode = #tpu.pipeline_mode<synchronous>, transform_indices = @transform_1, window_bounds = array<i64: 16, 8>}, {pipeline_mode = #tpu.pipeline_mode<synchronous>, transform_indices = @transform_2, window_bounds = array<i64: 8, 1>}, {pipeline_mode = #tpu.pipeline_mode<synchronous>, transform_indices = @transform_3, window_bounds = array<i64: 8, 16>}, {pipeline_mode = #tpu.pipeline_mode<synchronous>, transform_indices = @transform_4, window_bounds = array<i64: 8, 1>}, {pipeline_mode = #tpu.pipeline_mode<synchronous>, transform_indices = @transform_5, window_bounds = array<i64: 8, 1>}, {transform_indices = @transform_6, window_bounds = array<i64: 1, 8, 16>}]} {
    %c0 = arith.constant 0 : index
    %c0_0 = arith.constant 0 : index
    %c0_1 = arith.constant 0 : index
    %0 = vector.load %arg2[%c0, %c0_0, %c0_1] : memref<1x4x16xf32, #tpu.memory_space<vmem>>, vector<1x4x16xf32>
    %1 = vector.shape_cast %0 : vector<1x4x16xf32> to vector<4x16xf32>
    %cst = arith.constant 0.000000e+00 : f32
    %2 = vector.broadcast %cst : f32 to vector<4x1xf32>
    %c0_2 = arith.constant 0 : index
    %c0_3 = arith.constant 0 : index
    %3 = vector.load %arg9[%c0_2, %c0_3] : memref<8x17xf32, #tpu.memory_space<vmem>>, vector<4x1xf32>
    tpu.vector_store %arg9[%c0_2, %c0_3], %2 {strides = array<i32>} : memref<8x17xf32, #tpu.memory_space<vmem>>, vector<4x1xf32>,
    %c0_4 = arith.constant 0 : index
    %c1 = arith.constant 1 : index
    %4 = vector.load %arg9[%c0_4, %c1] : memref<8x17xf32, #tpu.memory_space<vmem>>, vector<4x16xf32>
    tpu.vector_store %arg9[%c0_4, %c1], %1 {strides = array<i32>} : memref<8x17xf32, #tpu.memory_space<vmem>>, vector<4x16xf32>,
    %cst_5 = arith.constant 0.000000e+00 : f32
    %5 = vector.broadcast %cst_5 : f32 to vector<4x2xf32>
    %c4 = arith.constant 4 : index
    %c0_6 = arith.constant 0 : index
    %6 = vector.load %arg9[%c4, %c0_6] : memref<8x17xf32, #tpu.memory_space<vmem>>, vector<4x2xf32>
    tpu.vector_store %arg9[%c4, %c0_6], %5 {strides = array<i32>} : memref<8x17xf32, #tpu.memory_space<vmem>>, vector<4x2xf32>,
    %7 = vector.extract_strided_slice %1 {offsets = [0, 0], sizes = [4, 15], strides = [1, 1]} : vector<4x16xf32> to vector<4x15xf32>
    %c4_7 = arith.constant 4 : index
    %c2 = arith.constant 2 : index
    %8 = vector.load %arg9[%c4_7, %c2] : memref<8x17xf32, #tpu.memory_space<vmem>>, vector<4x15xf32>
    tpu.vector_store %arg9[%c4_7, %c2], %7 {strides = array<i32>} : memref<8x17xf32, #tpu.memory_space<vmem>>, vector<4x15xf32>,
    %c0_8 = arith.constant 0 : index
    %c0_9 = arith.constant 0 : index
    %9 = vector.load %arg3[%c0_8, %c0_9] : memref<16x8xf32, #tpu.memory_space<vmem>>, vector<16x8xf32>
    %c0_10 = arith.constant 0 : index
    %c0_11 = arith.constant 0 : index
    %10 = vector.load %arg9[%c0_10, %c0_11] : memref<8x17xf32, #tpu.memory_space<vmem>>, vector<8x17xf32>
    %cst_12 = arith.constant dense<0.000000e+00> : vector<16x17xf32>
    %11 = tpu.matmul %9, %10, %cst_12 {dimension_numbers = #tpu.dot_dimension_numbers<[1], [0], [0], [1], [0, 0, 1, 1], [], []>} : vector<16x8xf32>, vector<8x17xf32>, vector<16x17xf32> -> vector<16x17xf32>
    %12 = vector.extract_strided_slice %11 {offsets = [8, 1], sizes = [8, 16], strides = [1, 1]} : vector<16x17xf32> to vector<8x16xf32>
    %c0_13 = arith.constant 0 : index
    %c0_14 = arith.constant 0 : index
    %13 = vector.load %arg7[%c0_13, %c0_14] : memref<8x1xf32, #tpu.memory_space<vmem>>, vector<8x1xf32>
    %14 = vector.broadcast %13 : vector<8x1xf32> to vector<8x16xf32>
    %15 = arith.addf %12, %14 : vector<8x16xf32>
    %16 = vector.extract_strided_slice %11 {offsets = [0, 0], sizes = [8, 17], strides = [1, 1]} : vector<16x17xf32> to vector<8x17xf32>
    %c0_15 = arith.constant 0 : index
    %c0_16 = arith.constant 0 : index
    %17 = vector.load %arg4[%c0_15, %c0_16] : memref<8x1xf32, #tpu.memory_space<vmem>>, vector<8x1xf32>
    %18 = vector.broadcast %17 : vector<8x1xf32> to vector<8x17xf32>
    %19 = arith.addf %16, %18 : vector<8x17xf32>
    %cst_17 = arith.constant 0.000000e+00 : f32
    %20 = vector.broadcast %cst_17 : f32 to vector<8x17xf32>
    %21 = arith.maximumf %19, %20 : vector<8x17xf32>
    %22 = vector.extract_strided_slice %21 {offsets = [0, 1], sizes = [8, 16], strides = [1, 1]} : vector<8x17xf32> to vector<8x16xf32>
    %c0_18 = arith.constant 0 : index
    %c0_19 = arith.constant 0 : index
    %23 = vector.load %arg10[%c0_18, %c0_19] : memref<16x16xf32, #tpu.memory_space<vmem>>, vector<8x16xf32>
    tpu.vector_store %arg10[%c0_18, %c0_19], %22 {strides = array<i32>} : memref<16x16xf32, #tpu.memory_space<vmem>>, vector<8x16xf32>,
    %24 = vector.extract_strided_slice %21 {offsets = [0, 0], sizes = [8, 16], strides = [1, 1]} : vector<8x17xf32> to vector<8x16xf32>
    %c8 = arith.constant 8 : index
    %c0_20 = arith.constant 0 : index
    %25 = vector.load %arg10[%c8, %c0_20] : memref<16x16xf32, #tpu.memory_space<vmem>>, vector<8x16xf32>
    tpu.vector_store %arg10[%c8, %c0_20], %24 {strides = array<i32>} : memref<16x16xf32, #tpu.memory_space<vmem>>, vector<8x16xf32>,
    %cst_21 = arith.constant 0.000000e+00 : f32
    %26 = vector.broadcast %cst_21 : f32 to vector<8x1xf32>
    %c8_22 = arith.constant 8 : index
    %c0_23 = arith.constant 0 : index
    %27 = vector.load %arg10[%c8_22, %c0_23] : memref<16x16xf32, #tpu.memory_space<vmem>>, vector<8x1xf32>
    tpu.vector_store %arg10[%c8_22, %c0_23], %26 {strides = array<i32>} : memref<16x16xf32, #tpu.memory_space<vmem>>, vector<8x1xf32>,
    %c0_24 = arith.constant 0 : index
    %c0_25 = arith.constant 0 : index
    %28 = vector.load %arg5[%c0_24, %c0_25] : memref<8x16xf32, #tpu.memory_space<vmem>>, vector<8x16xf32>
    %c0_26 = arith.constant 0 : index
    %c0_27 = arith.constant 0 : index
    %29 = vector.load %arg10[%c0_26, %c0_27] : memref<16x16xf32, #tpu.memory_space<vmem>>, vector<16x16xf32>
    %cst_28 = arith.constant dense<0.000000e+00> : vector<8x16xf32>
    %30 = tpu.matmul %28, %29, %cst_28 {dimension_numbers = #tpu.dot_dimension_numbers<[1], [0], [0], [1], [0, 0, 1, 1], [], []>} : vector<8x16xf32>, vector<16x16xf32>, vector<8x16xf32> -> vector<8x16xf32>
    %c0_29 = arith.constant 0 : index
    %c0_30 = arith.constant 0 : index
    %31 = vector.load %arg6[%c0_29, %c0_30] : memref<8x1xf32, #tpu.memory_space<vmem>>, vector<8x1xf32>
    %32 = vector.broadcast %31 : vector<8x1xf32> to vector<8x16xf32>
    %33 = arith.addf %30, %32 : vector<8x16xf32>
    %cst_31 = arith.constant 0.000000e+00 : f32
    %34 = vector.broadcast %cst_31 : f32 to vector<8x16xf32>
    %35 = arith.maximumf %33, %34 : vector<8x16xf32>
    %36 = arith.addf %35, %15 : vector<8x16xf32>
    %cst_32 = arith.constant 0.000000e+00 : f32
    %37 = vector.broadcast %cst_32 : f32 to vector<8x16xf32>
    %38 = arith.maximumf %36, %37 : vector<8x16xf32>
    %c0_33 = arith.constant 0 : index
    %c0_34 = arith.constant 0 : index
    %c0_35 = arith.constant 0 : index
    %39 = vector.load %arg8[%c0_33, %c0_34, %c0_35] : memref<1x8x16xf32, #tpu.memory_space<vmem>>, vector<1x8x16xf32>
    %40 = vector.shape_cast %39 : vector<1x8x16xf32> to vector<8x16xf32>
    %41 = vector.shape_cast %38 : vector<8x16xf32> to vector<1x8x16xf32>
    tpu.vector_store %arg8[%c0_33, %c0_34, %c0_35], %41 {strides = array<i32>} : memref<1x8x16xf32, #tpu.memory_space<vmem>>, vector<1x8x16xf32>,
    return
  }
  func.func @transform_0(%arg0: i32, %arg1: i32) -> (i32, i32, i32) {
    %c0_i32 = arith.constant 0 : i32
    %c0_i32_0 = arith.constant 0 : i32
    return %arg0, %c0_i32, %arg1 : i32, i32, i32
  }
  func.func @transform_1(%arg0: i32, %arg1: i32) -> (i32, i32) {
    %c0_i32 = arith.constant 0 : i32
    %c0_i32_0 = arith.constant 0 : i32
    %c0_i32_1 = arith.constant 0 : i32
    return %c0_i32, %c0_i32_0 : i32, i32
  }
  func.func @transform_2(%arg0: i32, %arg1: i32) -> (i32, i32) {
    %c0_i32 = arith.constant 0 : i32
    %c0_i32_0 = arith.constant 0 : i32
    %c0_i32_1 = arith.constant 0 : i32
    return %c0_i32, %c0_i32_0 : i32, i32
  }
  func.func @transform_3(%arg0: i32, %arg1: i32) -> (i32, i32) {
    %c0_i32 = arith.constant 0 : i32
    %c0_i32_0 = arith.constant 0 : i32
    %c0_i32_1 = arith.constant 0 : i32
    return %c0_i32, %c0_i32_0 : i32, i32
  }
  func.func @transform_4(%arg0: i32, %arg1: i32) -> (i32, i32) {
    %c0_i32 = arith.constant 0 : i32
    %c0_i32_0 = arith.constant 0 : i32
    %c0_i32_1 = arith.constant 0 : i32
    return %c0_i32, %c0_i32_0 : i32, i32
  }
  func.func @transform_5(%arg0: i32, %arg1: i32) -> (i32, i32) {
    %c0_i32 = arith.constant 0 : i32
    %c0_i32_0 = arith.constant 0 : i32
    %c0_i32_1 = arith.constant 0 : i32
    return %c0_i32, %c0_i32_0 : i32, i32
  }
  func.func @transform_6(%arg0: i32, %arg1: i32) -> (i32, i32, i32) {
    %c0_i32 = arith.constant 0 : i32
    %c0_i32_0 = arith.constant 0 : i32
    return %arg0, %c0_i32, %arg1 : i32, i32, i32
  }
}

</mosaic_0001>

<bundles_post_ra>
// kernel: tpu_custom_call.1
= control target key start
LH: loop header
LB: loop body
LE: loop exit
PB: predicated region body
PF: predicated region fallthrough
CT: control target
= control target key end

     0   :  { %11 = vsyncpa [#allocation5], 0  ;;  %s911_s0 = inlined_call_operand.vmem [shape: f32[2,4,16], index: 0, kind: input, shape index: {}]   ;;  %s912_s1 = inlined_call_operand.vmem [shape: f32[16,8], index: 1, kind: input, shape index: {}]   ;;  %s913_s2 = inlined_call_operand.vmem [shape: f32[8,1], index: 2, kind: input, shape index: {}]   ;;  %s914_s3 = inlined_call_operand.vmem [shape: f32[8,16], index: 3, kind: input, shape index: {}]   ;;  %s915_s4 = inlined_call_operand.vmem [shape: f32[8,1], index: 4, kind: input, shape index: {}]   ;;  %s916_s5 = inlined_call_operand.vmem [shape: f32[8,1], index: 5, kind: input, shape index: {}]   ;;  %s917_s6 = inlined_call_operand.hbm [shape: f32[2,8,16], index: 6, kind: output, shape index: {}]  }
   0x1   :  { %13 = vsyncpa [#allocation5 + $0x1], 0  ;;  %s788_s21 = smov 0   ;;  %s790_s22 = smov 0  }
   0x2   :  { %s792_s23 = smov 0   ;;  %s794_s24 = smov 0  }
   0x3   :  { %s796_s25 = smov 0   ;;  %s798_s26 = smov 0  }
   0x4 LB: > { %s573_s27 = sadd.s32 4294967295, %s744_s26   ;;  %s574_s28 = sadd.s32 4294967294, %s744_s26   ;;  %s744_s26 = sphi %s798_s26, %s19_s26   ;;  %s740_s25 = sphi %s796_s25, %s924_s25   ;;  %s736_s24 = sphi %s794_s24, %s923_s24   ;;  %s732_s23 = sphi %s792_s23, %s922_s23   ;;  %s728_s22 = sphi %s790_s22, %s921_s22   ;;  %s724_s21 = sphi %s788_s21, %s920_s21  }
   0x5   : > { %s31_s29 = sadd.s32 1, %s740_s25  ;;  %s173_s30 = sadd.s32 1, %s732_s23 }
   0x6   : > { %p33_p0 = scmp.ge.s32.totalorder %s31_s29, 2  ;;  %p183_p1 = scmp.ne.s32.totalorder %s732_s23, %s728_s22 }
   0x7   : > { %p184_p2 = scmp.eq.s32.totalorder %s573_s27, 1  ;;  %p189_p3 = scmp.ne.s32.totalorder %s728_s22, %s724_s21 }
   0x8   : > { %s926_s29 = smov (%p33_p0, %s31_s29), 0  ;;  %p190_p5 = scmp.eq.s32.totalorder %s574_s28, 1 }
   0x9   : > { %p828_p4 = por %p184_p2, %p183_p1  ;;  %s168_s8 = ssub.s32 %s740_s25, %s926_s29 }
   0xa   : > { %p577_p6 = scmp.ge.s32.totalorder %s744_s26, 1  ;;  %p171_p7 = scmp.eq.s32.totalorder %s168_s8, 0 }
   0xb   : > { %p835_p8 = por %p190_p5, %p189_p3  ;;  %p233_p9 = scmp.lt.s32.totalorder %s744_s26, 3 }
   0xc   : > { %s841_s10 = scalar_select %p171_p7, %s732_s23, %s173_s30  }
   0xd   : > { %p234_p10 = pnand %p577_p6, %p233_p9 }
   0xe   : > { %p265_p11 = scmp.lt.s32.totalorder (!%p234_p10), %s736_s24, 1  ;;  %s747_s18 = smov (!%p234_p10), 1  }
   0xf   : > { %237 = sbr.rel (%p234_p10) target bundleno = 691 (0x2b3), region = 44  ;;  %s749_s27 = smov (!%p234_p10), 2  }
  0x10   : > { %s262_s17 = sand.u32 (!%p234_p10), 1, %s728_s22   ;;  %s584_s19 = sshll.u32 (!%p234_p10), %s736_s24, 7 }
  0x11   : > { %s500_s8 = scalar_lea.hbm (!%p234_p10), %s917_s6, %s584_s19  ;;  %s752_s13 = smov (!%p234_p10), [#allocation4]  }
  0x12   : > { %s672_s14 = sshll.u32 (!%p234_p10), %s752_s13, 4  ;;  %s673_s14 = int_to_ptr.vmem [resolvable:$false] %s672_s14 }
  0x14   : > { %vm273_vm0 = vcmask 3072   ;;  %vm281_vm1 = vcmask 11264   ;;  %v746_v0 = vmov 0.0   ;;  %s266_s11 = scalar_select %p265_p11, %s736_s24, 1  ;;  %v288_v2 = vld [vmem:[%s912_s1] sm:$0xff]  ;;  %vm291_vm2 = vcmask 64512  }
  0x15   : > { %274 = vst.msk [vmem:[#allocation2] sm:$0xf] %vm273_vm0, %v746_v0  ;;  %598 = vmatprep.subr.mxu1 %v746_v0  ;;  %595 = vmatprep.mubr.msk.f32.mxu0 %vm291_vm2, %v288_v2  ;;  %v380_v3 = vld [vmem:[%s913_s2] sm:$0xff]  ;;  %v748_v4 = vmov 0   ;;  %vm279_vm3 = vcmask 134152   ;;  %vm286_vm4 = vcmask 134160  }
  0x16   : > { %282 = vst.msk [vmem:[#allocation2 + $0x4] sm:$0xf] %vm281_vm1, %v746_v0  ;;  %s579_s12 = sshll.u32 %s266_s11, 2  ;;  %667 = vset.pattern.permute.xlu0 %v748_v4  ;;  %666 = vset.pattern.permute.xlu1 %v748_v4  ;;  %v373_v5 = vld [vmem:[%s916_s5] sm:$0xff]  ;;  %v289_v9 = vld [vmem:[%s912_s1 + $0x8] sm:$0xff]  ;;  %vm750_vm5 = vmmov 0  }
  0x17   : > { %s271_s15 = scalar_lea.vmem %s911_s0, %s579_s12  ;;  %383 = vperm.xlu1 %666, %v380_v3   ;;  %602 = vmatprep.mubr.msk.f32.mxu1 %vm750_vm5, %v746_v0  ;;  %vm392_vm6 = vcmask 130048   ;;  %vm395_vm7 = vcmask 7168   ;;  %s751_s12 = smov 127   ;;  %v400_v15 = vld [vmem:[%s915_s4] sm:$0xff] }
  0x18   : > { %v272_v1 = vld [vmem:[%s271_s15] sm:$0xf]  ;;  %s488_s11 = scalar_lea.sflag [#allocation5], %s262_s17  ;;  %s674_s24 = scalar_lea.vmem %s673_s14, 256 }
  0x19   : > { %276 = vrot.lane.b32.xlu0 %v272_v1, %s747_s18  ;;  %v397_v20 = vld [vmem:[%s914_s3] sm:$0xff]  ;;  %s578_s18 = sshll.u32 %s262_s17, 3 }
  0x1a   : > { %s264_s20 = scalar_lea.vmem [#allocation4], %s578_s18 }
  0x1d   : > { %283 = vrot.lane.b32.xlu0 %v272_v1, %s749_s27  ;;  %s502_s27 = sshll.u32 %s264_s20, 4  ;;  %s503_s27 = int_to_ptr.vmem [resolvable:$true] %s502_s27 }
  0x1e   : > { %p675_p1 = scmp.lt.s32.totalorder %s503_s27, %s673_s14 }
  0x21   : > { %376 = vperm.xlu0 %667, %v373_v5  }
  0x8b   : > { %v277_v6 = vpop.permute.xlu0 %276 }
  0x8c   : > { %280 = vst.msk [vmem:[#allocation2] sm:$0xf] %vm279_vm3, %v277_v6 }
  0x8f   : > { %v284_v7 = vpop.permute.xlu0 %283 }
  0x90   : > { %287 = vst.msk [vmem:[#allocation2 + $0x4] sm:$0xf] %vm286_vm4, %v284_v7 }
  0x92   : > { %v384_v11 = vpop.permute.xlu1 %383 }
  0x97   : > { %v290_v8 = vld [vmem:[#allocation2] sm:$0xff] }
  0x98   : > { %593 = vmatprep.subr.mxu0 %v290_v8 }
  0x99   : > { %594 = vmatpush3.msra.mxu0 %v290_v8 }
  0x9a   : > { %596 = vmatmul.mubr.msk.f32.vlgmr.msra.gmra.mxu0 %vm291_vm2, %v289_v9 }
  0x9c   : > { %v377_v16 = vpop.permute.xlu0 %376 }
 0x15a   : > { %v597_v10 = vpop.f32.mrf.mxu0 }
 0x15b   : > { %v379_v17 = vadd.f32 %v597_v10, %v377_v16 }
 0x15c   : > { %v364_v12 = vpop.f32.mrf.mxu0 }
 0x15d   : > { %v386_v13 = vadd.f32 %v384_v11, %v364_v12 }
 0x15f   : > { %v387_v14 = vmax.f32 %v386_v13, 0.0 }
 0x161   : > { %394 = vst.msk [vmem:[#allocation3 + $0x8] sm:$0xff] %vm392_vm6, %v387_v14  ;;  %389 = vrot.lane.b32.xlu1 %v387_v14, %s751_s12 }
 0x162   : > { %396 = vst.msk [vmem:[#allocation3 + $0x8] sm:$0xff] %vm395_vm7, %v746_v0 }
 0x165   : > { %403 = vperm.xlu1 %666, %v400_v15  }
 0x169   : > { %481 = vrot.lane.b32.xlu1 %v379_v17, %s751_s12  ;;  %v399_v18 = vld [vmem:[#allocation3 + $0x8] sm:$0xff]  ;;  %s668_s12 = scalar_lea.vmem %s503_s27, 128 }
 0x16a   : > { %599 = vmatpush3.msra.mxu1 %v399_v18  ;;  %p669_p12 = scmp.ne.s32.totalorder %s503_s27, %s668_s12  ;;  %p676_p2 = scmp.lt.s32.totalorder %s674_s24, %s668_s12 }
 0x16b   : > { %600 = vmatprep.subr.mxu1 %v746_v0 }
 0x16c   : > { %p670_p13 = pnand %p669_p12, %p828_p4  ;;  %p677_p3 = por %p676_p2, %p675_p1 }
 0x16e   : > { %p671_p0 = pneg %p670_p13 }
 0x170   : > { %p678_p5 = pnand %p677_p3, %p671_p0 }
 0x1d3   : > { %v390_v19 = vpop.permute.xlu1 %389 }
 0x1d4   : > { %393 = vst.msk [vmem:[#allocation3] sm:$0xff] %vm392_vm6, %v390_v19 }
 0x1db   : > { %v398_v21 = vld [vmem:[#allocation3] sm:$0xff] }
 0x1dc   : > { %601 = vmatpush3.msra.mxu1 %v398_v21 }
 0x1dd   : > { %603 = vmatmul.mubr.msk.f32.vlgmr.msra.gmra.mxu1 %vm392_vm6, %v397_v20 }
 0x1e0   : > { %v404_v22 = vpop.permute.xlu1 %403 }
 0x1e4   : > { %v482_v27 = vpop.permute.xlu1 %481 }
 0x29d   : > { %v475_v23 = vpop.f32.mrf.mxu1 }
 0x29e   : > { %v476_v24 = vadd.f32 %v475_v23, %v404_v22 }
 0x29f   : > { %v604_v25 = vpop.f32.mrf.mxu1 }
 0x2a0   : > { %v479_v26 = vmax.f32 %v476_v24, 0.0 }
 0x2a2   : > { %v484_v28 = vadd.f32 %v482_v27, %v479_v26 }
 0x2a4   : > { %v485_v29 = vmax.f32 %v484_v28, 0.0 }
 0x2a6   : > { %486 = vst.msk [vmem:[%s264_s20] sm:$0xff] %vm392_vm6, %v485_v29 }
 0x2a7   : > { %681 = shalt.err (!%p678_p5)
}
 0x2a8   : > { %s682_s15 = scalar_lea.hbm %s500_s8, 128  ;;  %s686_s18 = scalar_lea.hbm %s917_s6, 256 }
 0x2a9   : > { %p683_p6 = scmp.ne.s32.totalorder %s500_s8, %s682_s15  ;;  %p687_p10 = scmp.lt.s32.totalorder %s500_s8, %s917_s6 }
 0x2aa   : > { %p688_p11 = scmp.lt.s32.totalorder %s686_s18, %s682_s15 }
 0x2ab   : > { %p684_p7 = pnand %p683_p6, %p828_p4 }
 0x2ac   : > { %p689_p12 = por %p688_p11, %p687_p10 }
 0x2ad   : > { %p685_p9 = pneg %p684_p7 }
 0x2af   : > { %p690_p13 = pnand %p689_p12, %p685_p9 }
 0x2b1   : > { %693 = shalt.err (!%p690_p13)
}
 0x2b2   : > { %605 = dma.vmem_to_hbm [thread:$0]  (%p828_p4), %s503_s27, 128, %s500_s8, %s488_s11  }
 0x2b3 PF: > { %p611_p0 = scmp.ge.s32.totalorder %s744_s26, 2  ;;  %s514_s28 = sand.u32 1, %s724_s21  }
 0x2b4   : > { %s515_s30 = scalar_lea.sflag [#allocation5], %s514_s28 }
 0x2b5   : > { %p608_p1 = pnand %p611_p0, %p835_p8 }
 0x2b7   : > { %p609_p2 = pneg %p608_p1 }
 0x2b9   : > { %719 = dma.done.wait (%p609_p2), %s515_s30, 128  }
 0x2ba   : > { %721 = vsyncadd (%p609_p2), %s515_s30, 4294967168  ;;  %s19_s26 = sadd.s32 1, %s744_s26   ;;  %s920_s21 = smov %s728_s22 }
 0x2bb   : > { %p16_p3 = scmp.ge.s32.totalorder %s19_s26, 4   ;;  %s921_s22 = smov %s732_s23 }
 0x2bc   : > { %s922_s23 = smov %s841_s10  ;;  %s923_s24 = smov %s740_s25 }
 0x2bd   : > { %s924_s25 = smov %s926_s29  ;;  %18 = sbr.rel (!%p16_p3) target bundleno = 4 (0x4), region = 79 }
 0x2c2   :  { %520 = vsyncpa [#allocation5], 1 }
 0x2c3   :  { %522 = vsyncpa [#allocation5 + $0x1], 1 }

</bundles_post_ra>
